<compile_context>
chip_gen: v6e
topology: v6e:2x2x1
jax: 0.10.0
libtpu: 0.0.40
codegen_flags: <defaults>
</compile_context>

<pallas_src>
import functools

import jax
import jax.numpy as jnp
from jax import lax
from jax.experimental import pallas as pl
from jax.experimental.pallas import tpu as pltpu


def _cdiv(a, b):
    return -(-a // b)


def _tpu_vmem_capacity_bytes():
    """Per-TensorCore VMEM capacity; conservative fallback if undetectable."""
    try:
        info = pltpu.get_tpu_info()
        for attr in ("vmem_capacity_bytes", "vmem_bytes", "vmem_size_bytes"):
            v = getattr(info, attr, None)
            if v:
                return int(v)
    except Exception:
        pass
    return 64 << 20          # v7x per-core size; safe lower bound everywhere


def _num_tensorcores():
    """TensorCores per chip (megacore): 2 on v4/v5p/v7x, 1 on v5e/v6e."""
    try:
        d = jax.devices()[0]
        v = getattr(d, "num_cores", None)
        if v:
            return max(1, int(v))
        kind = str(getattr(d, "device_kind", "")).lower()
        if any(tag in kind for tag in ("v4", "v5p", "v7", "tpu7")):
            return 2
    except Exception:
        pass
    return 1                 # safe default: single-core grid is always correct


def _pick_block_rows(n, c, itemsize, requested, vmem_limit_bytes):
    """Largest batch tile whose DMA buffers + f32 temporaries fit in VMEM.

    Per-row footprint:
      2 inputs x 2 pipeline buffers x C x itemsize    (BlockSpec DMA targets)
      + ~4 live (TB, C) f32 temporaries               (upcast/exp/log-softmax/w)
    """
    if requested is not None:
        tb = int(requested)
    else:
        per_row = 4 * c * itemsize + 4 * c * 4
        budget = int(vmem_limit_bytes * 0.75)          # headroom for the rest
        tb = budget // max(per_row, 1)
        tb = max(8, min(4096, (tb // 8) * 8))
    if tb >= n:
        return n                     # single block == full dim (always legal)
    return max(8, (tb // 8) * 8)     # second-to-last block dim: multiple of 8


def _label_smoothing_kernel(tgt_ref, p1_ref, p2_ref, out_ref, acc_ref, *,
                            confidence, smooth_val, n_rows, block_rows,
                            steps_per_shard, ignore_index, need_row_mask):
    j = pl.program_id(1)             # accumulation axis ("arbitrary")

    @pl.when(j == 0)
    def _():
        acc_ref[...] = jnp.zeros_like(acc_ref)

    # -true_dist folded into a weight select (no (TB, C) true_dist tensor).
    tgt = tgt_ref[...]                                        # (TB, 1) int32
    col = lax.broadcasted_iota(jnp.int32, p1_ref.shape, 1)    # class ids
    w = jnp.where(col == tgt, -confidence, -smooth_val)
    if ignore_index is not None and ignore_index:   # mirrors `if self.ignore_index:`
        w = jnp.where(col == ignore_index, 0.0, w)
        w = jnp.where(tgt == ignore_index, 0.0, w)

    if need_row_mask:
        # Rows past n_rows (partial trailing block / clamped duplicate block).
        # Uses the UNclamped block index so duplicate blocks zero out fully.
        blk = pl.program_id(0) * steps_per_shard + j
        rid = blk * block_rows + lax.broadcasted_iota(
            jnp.int32, (block_rows, 1), 0)
        valid = rid < n_rows                                  # (TB, 1) bool
    else:
        valid = None

    def stream_loss(x_ref):
        # Numerically stable log_softmax along the class (lane) axis, reduced
        # to a scalar immediately so only one stream's temporaries stay live.
        x = x_ref[...].astype(jnp.float32)
        xm = x - jnp.max(x, axis=-1, keepdims=True)
        ls = xm - jnp.log(jnp.sum(jnp.exp(xm), axis=-1, keepdims=True))
        contrib = w * ls
        if valid is not None:
            # Select (not multiply) so garbage padding rows cannot inject NaN.
            contrib = jnp.where(valid, contrib, 0.0)
        return jnp.sum(contrib)

    acc_ref[...] += stream_loss(p1_ref) + stream_loss(p2_ref)

    @pl.when(j == pl.num_programs(1) - 1)
    def _():
        out_ref[...] = jnp.broadcast_to(acc_ref[...].reshape(1, 1, 1),
                                        out_ref.shape)


def label_smoothing_loss(y_hat1, y_hat2, target, *, classes, smoothing=0.0,
                         ignore_index=None, block_rows=None, num_shards=None):
    """y_hat1, y_hat2: (N, C) float (f32 or bf16); target: (N,) int -> scalar f32.

    Module-matching quirks (intentional):
      * ignore_index is gated by Python truthiness (ignore_index=0 disables it).
      * The mean divides by the full batch size even when rows are ignored.
    """
    n, c = y_hat1.shape
    assert y_hat2.shape == (n, c) and c == classes

    itemsize = jnp.dtype(y_hat1.dtype).itemsize
    capacity = _tpu_vmem_capacity_bytes()
    vmem_limit = max(32 << 20, min((capacity * 3) // 4, 96 << 20))

    tb = _pick_block_rows(n, c, itemsize, block_rows, vmem_limit)
    total_blocks = _cdiv(n, tb)

    if num_shards is None:
        cores = _num_tensorcores()
        num_shards = cores if (cores > 1 and total_blocks >= cores) else 1
    if num_shards > 1 and total_blocks % num_shards != 0 and block_rows is None:
        # Shrink the tile so blocks split evenly across cores: removes the
        # clamped duplicate-block DMA (pure wasted HBM traffic when mem-bound).
        target_blocks = num_shards * _cdiv(total_blocks, num_shards)
        tb2 = max(8, ((_cdiv(n, target_blocks) + 7) // 8) * 8)
        if _cdiv(n, tb2) % num_shards == 0:
            tb = tb2
            total_blocks = _cdiv(n, tb)

    steps = _cdiv(total_blocks, num_shards)
    has_pad_block = steps * num_shards != total_blocks
    need_row_mask = (n % tb != 0) or has_pad_block

    if has_pad_block:
        # Padded step re-reads the last real block; its rows get masked inside.
        def blk_idx(p, j):
            return jnp.minimum(p * steps + j, total_blocks - 1)
    else:
        def blk_idx(p, j):
            return p * steps + j

    tgt2d = target.astype(jnp.int32).reshape(n, 1)

    kernel = functools.partial(
        _label_smoothing_kernel,
        confidence=1.0 - smoothing,
        smooth_val=smoothing / (classes - 1),
        n_rows=n,
        block_rows=tb,
        steps_per_shard=steps,
        ignore_index=ignore_index,
        need_row_mask=need_row_mask,
    )

    cost = pl.CostEstimate(
        flops=int(12 * n * c),
        transcendentals=int(2 * n * c + 2 * n),
        bytes_accessed=int(n * (2 * c * itemsize + 4)
                           + num_shards * 8 * 128 * 4),
    )

    out = pl.pallas_call(
        kernel,
        out_shape=jax.ShapeDtypeStruct((num_shards, 8, 128), jnp.float32),
        grid_spec=pltpu.PrefetchScalarGridSpec(
            num_scalar_prefetch=0,
            grid=(num_shards, steps),
            in_specs=[
                pl.BlockSpec((tb, 1), lambda p, j: (blk_idx(p, j), 0)),  # target
                pl.BlockSpec((tb, c), lambda p, j: (blk_idx(p, j), 0)),  # y_hat1
                pl.BlockSpec((tb, c), lambda p, j: (blk_idx(p, j), 0)),  # y_hat2
            ],
            out_specs=pl.BlockSpec((1, 8, 128), lambda p, j: (p, 0, 0)),
            scratch_shapes=[pltpu.VMEM((1, 1), jnp.float32)],
        ),
        compiler_params=pltpu.CompilerParams(
            dimension_semantics=("parallel", "arbitrary"),
            vmem_limit_bytes=int(vmem_limit),
        ),
        cost_estimate=cost,
    )(tgt2d, y_hat1, y_hat2)

    # Sum per-shard partials; normalize by the full batch (matches torch.mean).
    return jnp.sum(out[:, 0, 0]) / jnp.float32(n)


def _reference(y_hat1, y_hat2, target, classes, smoothing, ignore_index=None):
    lp = (jax.nn.log_softmax(y_hat1.astype(jnp.float32), axis=-1)
          + jax.nn.log_softmax(y_hat2.astype(jnp.float32), axis=-1))
    td = jnp.full_like(lp, smoothing / (classes - 1))
    td = td.at[jnp.arange(lp.shape[0]), target].set(1.0 - smoothing)
    if ignore_index is not None and ignore_index:
        td = td.at[:, ignore_index].set(0.0)
        td = jnp.where((target == ignore_index)[:, None], 0.0, td)
    return jnp.mean(jnp.sum(-td * lp, axis=-1))


if __name__ == "__main__":
    key = jax.random.PRNGKey(0)
    k1, k2, k3, k4, k5, k6, k7, k8, k9 = jax.random.split(key, 9)

    # Case 1: small, single block, no ignore_index (module defaults), f32.
    N, C, smoothing = 16, 128, 0.1
    y1 = jax.random.normal(k1, (N, C), dtype=jnp.float32)
    y2 = jax.random.normal(k2, (N, C), dtype=jnp.float32)
    tg = jax.random.randint(k3, (N,), 0, C, dtype=jnp.int32)
    loss = jax.block_until_ready(
        label_smoothing_loss(y1, y2, tg, classes=C, smoothing=smoothing))
    ref = _reference(y1, y2, tg, C, smoothing)
    assert jnp.allclose(loss, ref, rtol=1e-5, atol=1e-5), (loss, ref)

    # Case 2: non-divisible N, multi-block path, ignore_index set, f32.
    N2, C2, ign = 20, 128, 5
    y1b = jax.random.normal(k4, (N2, C2), dtype=jnp.float32)
    y2b = jax.random.normal(k5, (N2, C2), dtype=jnp.float32)
    tgb = jax.random.randint(k6, (N2,), 0, C2, dtype=jnp.int32)
    tgb = tgb.at[3].set(ign)   # exercise the ignored-row path
    loss2 = jax.block_until_ready(
        label_smoothing_loss(y1b, y2b, tgb, classes=C2, smoothing=smoothing,
                             ignore_index=ign, block_rows=8))
    ref2 = _reference(y1b, y2b, tgb, C2, smoothing, ignore_index=ign)
    assert jnp.allclose(loss2, ref2, rtol=1e-5, atol=1e-5), (loss2, ref2)

    # Case 3: bf16 logits (the big HBM-bandwidth lever), partial trailing block.
    N3, C3 = 40, 128
    y1c = jax.random.normal(k7, (N3, C3), dtype=jnp.bfloat16)
    y2c = jax.random.normal(k8, (N3, C3), dtype=jnp.bfloat16)
    tgc = jax.random.randint(k9, (N3,), 0, C3, dtype=jnp.int32)
    loss3 = jax.block_until_ready(
        label_smoothing_loss(y1c, y2c, tgc, classes=C3, smoothing=smoothing,
                             block_rows=16))
    ref3 = _reference(y1c, y2c, tgc, C3, smoothing)
    assert jnp.allclose(loss3, ref3, rtol=1e-4, atol=1e-4), (loss3, ref3)

    print("KERNEL_OK")
</pallas_src>

<mosaic_0001>
module attributes {stable_mosaic.version = 11 : i64} {
  func.func @_label_smoothing_kernel(%arg0: i32, %arg1: i32, %arg2: memref<16x1xi32, #tpu.memory_space<vmem>>, %arg3: memref<16x128xf32, #tpu.memory_space<vmem>>, %arg4: memref<16x128xf32, #tpu.memory_space<vmem>>, %arg5: memref<1x8x128xf32, #tpu.memory_space<vmem>>, %arg6: memref<1x1xf32, #tpu.memory_space<vmem>>) attributes {dimension_semantics = [#tpu.dimension_semantics<parallel>, #tpu.dimension_semantics<arbitrary>], iteration_bounds = array<i64: 1, 1>, scalar_prefetch = 0 : i64, scratch_operands = 1 : i64, tpu.core_type = #tpu.core_type<tc>, window_params = [{transform_indices = @transform_0, window_bounds = array<i64: 16, 1>}, {transform_indices = @transform_1, window_bounds = array<i64: 16, 128>}, {transform_indices = @transform_2, window_bounds = array<i64: 16, 128>}, {transform_indices = @transform_3, window_bounds = array<i64: 1, 8, 128>}]} {
    %c0_i32 = arith.constant 0 : i32
    %0 = arith.cmpi eq, %arg1, %c0_i32 : i32
    %1 = arith.extui %0 : i1 to i32
    %c0_i32_0 = arith.constant 0 : i32
    %2 = arith.cmpi ne, %1, %c0_i32_0 : i32
    scf.if %2 {
      %cst_19 = arith.constant 0.000000e+00 : f32
      %50 = vector.broadcast %cst_19 : f32 to vector<1x1xf32>
      %c0_20 = arith.constant 0 : index
      %c0_21 = arith.constant 0 : index
      %51 = vector.load %arg6[%c0_20, %c0_21] : memref<1x1xf32, #tpu.memory_space<vmem>>, vector<1x1xf32>
      tpu.vector_store %arg6[%c0_20, %c0_21], %50 {strides = array<i32>} : memref<1x1xf32, #tpu.memory_space<vmem>>, vector<1x1xf32>,
    } else {
    }
    %c0 = arith.constant 0 : index
    %c0_1 = arith.constant 0 : index
    %3 = vector.load %arg2[%c0, %c0_1] : memref<16x1xi32, #tpu.memory_space<vmem>>, vector<16x1xi32>
    %4 = tpu.iota {dimensions = array<i32: 1>} : vector<16x128xi32>
    %5 = vector.broadcast %3 : vector<16x1xi32> to vector<16x128xi32>
    %6 = arith.cmpi eq, %4, %5 : vector<16x128xi32>
    %cst = arith.constant -0.899999976 : f32
    %cst_2 = arith.constant -7.87401571E-4 : f32
    %7 = vector.broadcast %cst : f32 to vector<16x128xf32>
    %8 = vector.broadcast %cst_2 : f32 to vector<16x128xf32>
    %9 = arith.select %6, %7, %8 : vector<16x128xi1>, vector<16x128xf32>
    %c0_3 = arith.constant 0 : index
    %c0_4 = arith.constant 0 : index
    %10 = vector.load %arg6[%c0_3, %c0_4] : memref<1x1xf32, #tpu.memory_space<vmem>>, vector<1x1xf32>
    %c0_5 = arith.constant 0 : index
    %c0_6 = arith.constant 0 : index
    %11 = vector.load %arg3[%c0_5, %c0_6] : memref<16x128xf32, #tpu.memory_space<vmem>>, vector<16x128xf32>
    %cst_7 = arith.constant dense<0xFF800000> : vector<16xf32>
    %12 = vector.multi_reduction <maximumf>, %11, %cst_7 [1] : vector<16x128xf32> to vector<16xf32>
    %13 = vector.shape_cast %12 : vector<16xf32> to vector<16x1xf32>
    %14 = vector.broadcast %13 : vector<16x1xf32> to vector<16x128xf32>
    %15 = arith.subf %11, %14 : vector<16x128xf32>
    %16 = math.exp %15 : vector<16x128xf32>
    %cst_8 = arith.constant dense<0.000000e+00> : vector<16xf32>
    %17 = vector.multi_reduction <add>, %16, %cst_8 [1] : vector<16x128xf32> to vector<16xf32>
    %18 = vector.shape_cast %17 : vector<16xf32> to vector<16x1xf32>
    %19 = math.log %18 : vector<16x1xf32>
    %20 = vector.broadcast %19 : vector<16x1xf32> to vector<16x128xf32>
    %21 = arith.subf %15, %20 : vector<16x128xf32>
    %22 = arith.mulf %9, %21 : vector<16x128xf32>
    %23 = vector.shape_cast %22 : vector<16x128xf32> to vector<1x16x128xf32>
    %cst_9 = arith.constant dense<0.000000e+00> : vector<1xf32>
    %24 = vector.multi_reduction <add>, %23, %cst_9 [1, 2] : vector<1x16x128xf32> to vector<1xf32>
    %25 = vector.shape_cast %24 : vector<1xf32> to vector<1x1x1xf32>
    %26 = vector.extract %25[0, 0, 0] : f32 from vector<1x1x1xf32>
    %c0_10 = arith.constant 0 : index
    %c0_11 = arith.constant 0 : index
    %27 = vector.load %arg4[%c0_10, %c0_11] : memref<16x128xf32, #tpu.memory_space<vmem>>, vector<16x128xf32>
    %cst_12 = arith.constant dense<0xFF800000> : vector<16xf32>
    %28 = vector.multi_reduction <maximumf>, %27, %cst_12 [1] : vector<16x128xf32> to vector<16xf32>
    %29 = vector.shape_cast %28 : vector<16xf32> to vector<16x1xf32>
    %30 = vector.broadcast %29 : vector<16x1xf32> to vector<16x128xf32>
    %31 = arith.subf %27, %30 : vector<16x128xf32>
    %32 = math.exp %31 : vector<16x128xf32>
    %cst_13 = arith.constant dense<0.000000e+00> : vector<16xf32>
    %33 = vector.multi_reduction <add>, %32, %cst_13 [1] : vector<16x128xf32> to vector<16xf32>
    %34 = vector.shape_cast %33 : vector<16xf32> to vector<16x1xf32>
    %35 = math.log %34 : vector<16x1xf32>
    %36 = vector.broadcast %35 : vector<16x1xf32> to vector<16x128xf32>
    %37 = arith.subf %31, %36 : vector<16x128xf32>
    %38 = arith.mulf %9, %37 : vector<16x128xf32>
    %39 = vector.shape_cast %38 : vector<16x128xf32> to vector<1x16x128xf32>
    %cst_14 = arith.constant dense<0.000000e+00> : vector<1xf32>
    %40 = vector.multi_reduction <add>, %39, %cst_14 [1, 2] : vector<1x16x128xf32> to vector<1xf32>
    %41 = vector.shape_cast %40 : vector<1xf32> to vector<1x1x1xf32>
    %42 = vector.extract %41[0, 0, 0] : f32 from vector<1x1x1xf32>
    %43 = arith.addf %26, %42 : f32
    %44 = vector.broadcast %43 : f32 to vector<1x1xf32>
    %45 = arith.addf %10, %44 : vector<1x1xf32>
    %c0_15 = arith.constant 0 : index
    %c0_16 = arith.constant 0 : index
    %46 = vector.load %arg6[%c0_15, %c0_16] : memref<1x1xf32, #tpu.memory_space<vmem>>, vector<1x1xf32>
    tpu.vector_store %arg6[%c0_15, %c0_16], %45 {strides = array<i32>} : memref<1x1xf32, #tpu.memory_space<vmem>>, vector<1x1xf32>,
    %c0_i32_17 = arith.constant 0 : i32
    %47 = arith.cmpi eq, %arg1, %c0_i32_17 : i32
    %48 = arith.extui %47 : i1 to i32
    %c0_i32_18 = arith.constant 0 : i32
    %49 = arith.cmpi ne, %48, %c0_i32_18 : i32
    scf.if %49 {
      %c0_19 = arith.constant 0 : index
      %c0_20 = arith.constant 0 : index
      %50 = vector.load %arg6[%c0_19, %c0_20] : memref<1x1xf32, #tpu.memory_space<vmem>>, vector<1x1xf32>
      %51 = vector.shape_cast %50 : vector<1x1xf32> to vector<1x1x1xf32>
      %52 = vector.shape_cast %51 : vector<1x1x1xf32> to vector<1x1x1xf32>
      %53 = vector.broadcast %52 : vector<1x1x1xf32> to vector<1x8x128xf32>
      %c0_21 = arith.constant 0 : index
      %c0_22 = arith.constant 0 : index
      %c0_23 = arith.constant 0 : index
      %54 = vector.load %arg5[%c0_21, %c0_22, %c0_23] : memref<1x8x128xf32, #tpu.memory_space<vmem>>, vector<1x8x128xf32>
      tpu.vector_store %arg5[%c0_21, %c0_22, %c0_23], %53 {strides = array<i32>} : memref<1x8x128xf32, #tpu.memory_space<vmem>>, vector<1x8x128xf32>,
    } else {
    }
    return
  }
  func.func @transform_0(%arg0: i32, %arg1: i32) -> (i32, i32) {
    %c1_i32 = arith.constant 1 : i32
    %0 = arith.muli %arg0, %c1_i32 : i32
    %1 = arith.addi %0, %arg1 : i32
    %c0_i32 = arith.constant 0 : i32
    %c0_i32_0 = arith.constant 0 : i32
    return %1, %c0_i32 : i32, i32
  }
  func.func @transform_1(%arg0: i32, %arg1: i32) -> (i32, i32) {
    %c1_i32 = arith.constant 1 : i32
    %0 = arith.muli %arg0, %c1_i32 : i32
    %1 = arith.addi %0, %arg1 : i32
    %c0_i32 = arith.constant 0 : i32
    %c0_i32_0 = arith.constant 0 : i32
    return %1, %c0_i32 : i32, i32
  }
  func.func @transform_2(%arg0: i32, %arg1: i32) -> (i32, i32) {
    %c1_i32 = arith.constant 1 : i32
    %0 = arith.muli %arg0, %c1_i32 : i32
    %1 = arith.addi %0, %arg1 : i32
    %c0_i32 = arith.constant 0 : i32
    %c0_i32_0 = arith.constant 0 : i32
    return %1, %c0_i32 : i32, i32
  }
  func.func @transform_3(%arg0: i32, %arg1: i32) -> (i32, i32, i32) {
    %c0_i32 = arith.constant 0 : i32
    %c0_i32_0 = arith.constant 0 : i32
    %c0_i32_1 = arith.constant 0 : i32
    return %arg0, %c0_i32, %c0_i32_0 : i32, i32, i32
  }
}

</mosaic_0001>

<bundles_post_ra>
// kernel: tpu_custom_call.1
= control target key start
LH: loop header
LB: loop body
LE: loop exit
PB: predicated region body
PF: predicated region fallthrough
CT: control target
= control target key end

     0   :  { %8 = vsyncpa [#allocation4], 0  ;;  %s335_s0 = inlined_call_operand.vmem [shape: s32[16,1], index: 0, kind: input, shape index: {}]   ;;  %s336_s1 = inlined_call_operand.vmem [shape: f32[16,128], index: 1, kind: input, shape index: {}]   ;;  %s337_s2 = inlined_call_operand.hbm [shape: f32[16,128], index: 2, kind: input, shape index: {}]   ;;  %s338_s3 = inlined_call_operand.hbm [shape: f32[1,8,128], index: 3, kind: output, shape index: {}]  }
   0x1   :  { %9 = vsyncpa [#allocation5], 0  ;;  %s288_s12 = smov [#allocation3]  }
   0x2   :  { %s39_s13 = sshll.u32 %s288_s12, 4  ;;  %s40_s13 = int_to_ptr.vmem [resolvable:$true] %s39_s13 }
   0x3   :  { %s252_s14 = scalar_lea.vmem %s40_s13, 256  ;;  %p257_p1 = scmp.lt.s32.totalorder %s40_s13, %s40_s13 }
   0x4   :  { %p253_p0 = scmp.ne.s32.totalorder %s40_s13, %s252_s14  ;;  %p258_p2 = scmp.lt.s32.totalorder %s252_s14, %s252_s14 }
   0x6   :  { %p259_p3 = por %p258_p2, %p257_p1 }
   0x8   :  { %p260_p4 = pnand %p259_p3, %p253_p0 }
   0xa   :  { %263 = shalt.err (!%p260_p4)
}
   0xb   :  { %s289_s15 = smov 128   ;;  %s290_s16 = smov 8  }
   0xc   :  { %45 = dma.hbm_to_vmem [thread:$0]  %s337_s2, 256, %s40_s13, [#allocation4], %s289_s15, %s289_s15, %s290_s16  }
   0xd   :  { %284 = dma.done.wait [#allocation4], 256  }
   0xe   :  { %285 = vsyncadd [#allocation4], 4294967040  ;;  %v100_v0 = vld [vmem:[%s336_s1] sm:$0xff]  ;;  %v101_v2 = vld [vmem:[%s336_s1 + $0x8] sm:$0xff]  ;;  %v291_v4 = vmov 0   ;;  %v87_v27 = vlaneseq  ;;  %vm83_vm2 = vcmask 0  }
   0xf   :  { %v134_v1 = vld [vmem:[#allocation3] sm:$0xff]  ;;  %102 = vmax.xlane.f32.xlu0 %v100_v0  ;;  %v135_v3 = vld [vmem:[#allocation3 + $0x8] sm:$0xff]  ;;  %227 = vset.pattern.permute.xlu1 %v291_v4  ;;  %v292_v38 = vmov -0.0007874016   ;;  %v293_v52 = vmov 0.0   ;;  %s294_s27 = smov [#allocation6]  }
  0x10   :  { %136 = vmax.xlane.f32.xlu1 %v134_v1  ;;  %226 = vset.pattern.permute.xlu0 %v291_v4  ;;  %v86_v21 = vld [vmem:[%s335_s0 + $0x8] sm:$0xff]  ;;  %v85_v22 = vld [vmem:[%s335_s0] sm:$0xff]  ;;  %v88_v28 = vand.u32 127, %v87_v27  ;;  %84 = vst.msk [vmem:[#allocation2] sm:$0x1] %vm83_vm2, %v293_v52  ;;  %s193_s28 = sshll.u32 %s294_s27, 4  ;;  %s194_s28 = int_to_ptr.vmem [resolvable:$true] %s193_s28 }
  0x11   :  { %s264_s29 = scalar_lea.vmem %s194_s28, 128  ;;  %p269_p6 = scmp.lt.s32.totalorder %s194_s28, %s194_s28 }
  0x12   :  { %p265_p5 = scmp.ne.s32.totalorder %s194_s28, %s264_s29  ;;  %p270_p7 = scmp.lt.s32.totalorder %s264_s29, %s264_s29 }
  0x13   :  { %104 = vmax.xlane.f32.xlu0 %v101_v2 }
  0x14   :  { %138 = vmax.xlane.f32.xlu1 %v135_v3  ;;  %p271_p8 = por %p270_p7, %p269_p6 }
  0x16   :  { %p272_p9 = pnand %p271_p8, %p265_p5 }
  0x98   :  { %v103_v5 = vpop.xlane.xlu0 %102 }
  0x99   :  { %v137_v6 = vpop.xlane.xlu1 %136  ;;  %v106_v7 = vsub.f32 %v100_v0, %v103_v5 }
  0x9a   :  { %v140_v8 = vsub.f32 %v134_v1, %v137_v6 }
  0x9b   :  { %v108_v9 = vmul.f32 1.442695, %v106_v7 }
  0x9c   :  { %v142_v10 = vmul.f32 1.442695, %v140_v8  ;;  %v105_v11 = vpop.xlane.xlu0 %104 }
  0x9d   :  { %v139_v12 = vpop.xlane.xlu1 %138  ;;  %228 = vpow2.f32 %v108_v9  ;;  %v107_v13 = vsub.f32 %v101_v2, %v105_v11 }
  0x9e   :  { %v141_v14 = vsub.f32 %v135_v3, %v139_v12  ;;  %230 = vpow2.f32 %v142_v10  ;;  %v99_v3 = vld [vmem:[#allocation2] sm:$0x1] }
  0x9f   :  { %v110_v15 = vmul.f32 1.442695, %v107_v13 }
  0xa0   :  { %v144_v16 = vmul.f32 1.442695, %v141_v14 }
  0xa1   :  { %232 = vpow2.f32 %v110_v15 }
  0xa2   :  { %234 = vpow2.f32 %v144_v16 }
  0xaa   :  { %v229_v17 = vpop.eup %228 }
  0xab   :  { %112 = vadd.xlane.f32.xlu0 %v229_v17  ;;  %v231_v18 = vpop.eup %230 }
  0xae   :  { %v233_v19 = vpop.eup %232 }
  0xaf   :  { %146 = vadd.xlane.f32.xlu0 %v231_v18  ;;  %114 = vadd.xlane.f32.xlu1 %v233_v19  ;;  %v235_v20 = vpop.eup %234 }
  0xb3   :  { %148 = vadd.xlane.f32.xlu1 %v235_v20 }
  0xc4   :  { %93 = vperm.xlu1 %227, %v86_v21  }
  0xc5   :  { %90 = vperm.xlu0 %226, %v85_v22  }
 0x134   :  { %v113_v23 = vpop.xlane.xlu0 %112 }
 0x135   :  { %236 = vlog2.f32 %v113_v23 }
 0x138   :  { %v115_v24 = vpop.xlane.xlu1 %114  ;;  %v147_v25 = vpop.xlane.xlu0 %146 }
 0x139   :  { %238 = vlog2.f32 %v115_v24 }
 0x13a   :  { %240 = vlog2.f32 %v147_v25 }
 0x13c   :  { %v149_v26 = vpop.xlane.xlu1 %148 }
 0x13d   :  { %242 = vlog2.f32 %v149_v26 }
 0x140   :  { %v91_v30 = vpop.permute.xlu0 %90  ;;  %v94_v31 = vpop.permute.xlu1 %93 }
 0x141   :  { %vm95_vm0 = vcmp.eq.s32.totalorder %v88_v28, %v91_v30  ;;  %vm96_vm1 = vcmp.eq.s32.totalorder %v88_v28, %v94_v31 }
 0x142   :  { %v237_v29 = vpop.eup %236  ;;  %v97_v39 = vsel %vm95_vm0, -0.9, %v292_v38  ;;  %v98_v40 = vsel %vm96_vm1, -0.9, %v292_v38 }
 0x143   :  { %v117_v32 = vmul.f32 0.6931472, %v237_v29 }
 0x145   :  { %v120_v36 = vsub.f32 %v106_v7, %v117_v32 }
 0x146   :  { %v239_v33 = vpop.eup %238 }
 0x147   :  { %v241_v34 = vpop.eup %240  ;;  %v119_v35 = vmul.f32 0.6931472, %v239_v33  ;;  %v122_v45 = vmul.f32 %v120_v36, %v97_v39 }
 0x148   :  { %v151_v37 = vmul.f32 0.6931472, %v241_v34 }
 0x149   :  { %v121_v41 = vsub.f32 %v107_v13, %v119_v35 }
 0x14a   :  { %v243_v42 = vpop.eup %242  ;;  %v154_v44 = vsub.f32 %v140_v8, %v151_v37 }
 0x14b   :  { %v153_v43 = vmul.f32 0.6931472, %v243_v42  ;;  %v123_v46 = vmul.f32 %v121_v41, %v98_v40 }
 0x14c   :  { %v156_v49 = vmul.f32 %v154_v44, %v97_v39 }
 0x14d   :  { %v155_v47 = vsub.f32 %v141_v14, %v153_v43  ;;  %v124_v48 = vadd.f32 %v123_v46, %v122_v45 }
 0x14f   :  { %v157_v50 = vmul.f32 %v155_v47, %v98_v40  ;;  %125 = vadd.xlane.f32.xlu1 %v124_v48 }
 0x151   :  { %v158_v51 = vadd.f32 %v157_v50, %v156_v49 }
 0x153   :  { %159 = vadd.xlane.f32.xlu0 %v158_v51 }
 0x1d8   :  { %v126_v53 = vpop.xlane.xlu1 %125 }
 0x1d9   :  { %v127_v54 = vrot.slane %v126_v53, 4 }
 0x1db   :  { %v128_v55 = vadd.f32 %v127_v54, %v126_v53 }
 0x1dc   :  { %v160_v56 = vpop.xlane.xlu0 %159 }
 0x1dd   :  { %v129_v57 = vrot.slane %v128_v55, 2  ;;  %v161_v58 = vrot.slane %v160_v56, 4 }
 0x1df   :  { %v162_v59 = vadd.f32 %v161_v58, %v160_v56  ;;  %v130_v60 = vadd.f32 %v129_v57, %v128_v55 }
 0x1e1   :  { %v163_v61 = vrot.slane %v162_v59, 2  ;;  %v131_v62 = vrot.slane %v130_v60, 1 }
 0x1e3   :  { %v164_v63 = vadd.f32 %v163_v61, %v162_v59  ;;  %v132_v0 = vadd.f32 %v131_v62, %v130_v60 }
 0x1e5   :  { %215 = vpush %v132_v0  ;;  %v165_v1 = vrot.slane %v164_v63, 1 }
 0x1e7   :  { %v166_v2 = vadd.f32 %v165_v1, %v164_v63 }
 0x1e9   :  { %217 = vpush %v166_v2 }
 0x216   :  { %s216_s0 = spop %215 }
 0x21a   :  { %s218_s25 = spop %217 }
 0x21b   :  { %s168_s26 = sadd.f32 %s218_s25, %s216_s0 }
 0x21d   :  { %v169_v4 = vstv %s168_s26 }
 0x21e   :  { %v170_v5 = vadd.f32 %v169_v4, %v99_v3 }
 0x220   :  { %172 = vst.msk [vmem:[#allocation2] sm:$0x1] %vm83_vm2, %v170_v5 }
 0x227   :  { %v214_v6 = vld [vmem:[#allocation2] ss:$0 sm:$0xff] }
 0x228   :  { %183 = vperm.xlu1 %227, %v214_v6  }
 0x2a3   :  { %v184_v7 = vpop.permute.xlu1 %183 }
 0x2a4   :  { %186 = vst [vmem:[#allocation6] sm:$0xff] %v184_v7 }
 0x2a5   :  { %275 = shalt.err (!%p272_p9)
}
 0x2a6   :  { %196 = dma.vmem_to_hbm [thread:$0]  %s194_s28, 128, %s338_s3, [#allocation5]  }
 0x2a7   :  { %286 = dma.done.wait [#allocation5], 128  }
 0x2a8   :  { %287 = vsyncadd [#allocation5], 4294967168 }
 0x2a9   :  { %200 = vsyncpa [#allocation4], 1 }
 0x2aa   :  { %201 = vsyncpa [#allocation5], 1 }

</bundles_post_ra>
